<compile_context>
chip_gen: v7x
topology: tpu7x:2x2x1
jax: 0.10.0
libtpu: 0.0.40
codegen_flags: <defaults>
</compile_context>

<pallas_src>
import jax
import jax.numpy as jnp
from jax.experimental import pallas as pl
from jax.experimental.pallas import tpu as pltpu

_EPS = 1e-5  # nn.BatchNorm2d default


def _make_basic_block_kernel(H, W, C):
    """Fused BasicBlock kernel for one image: x (C, H*W) -> out (C, H*W)."""
    HW = H * W
    PAD = W + 1  # flat halo on each side of the shifted-rows scratch

    def kernel(x_ref, mask_ref, w1_ref, b1_ref, w2_ref, b2_ref, o_ref,
               shift_ref, col_ref):
        x_cf = x_ref[0].astype(jnp.float32)              # (C, HW), lane-dense

        def build_cols(v):
            # Zero the scratch (masked-out taps must read finite values), then
            # write the interior.  Re-done every grid step so correctness does
            # not depend on how the "parallel" axis is sharded across cores.
            shift_ref[...] = jnp.zeros_like(shift_ref)
            shift_ref[:, PAD:PAD + HW] = v
            for ky in range(3):
                for kx in range(3):
                    t = ky * 3 + kx
                    off = (ky - 1) * W + (kx - 1)
                    piece = shift_ref[:, PAD + off:PAD + off + HW]   # (C, HW)
                    piece = piece * mask_ref[t:t + 1, :]             # kill wraps
                    col_ref[t * C:(t + 1) * C, :] = piece

        # conv1 + folded BN1 + ReLU  --  a single MXU matmul with K = 9*C.
        build_cols(x_cf)
        h1 = jnp.dot(w1_ref[...], col_ref[...],
                     preferred_element_type=jnp.float32) + b1_ref[...]
        h1 = jnp.maximum(h1, 0.0)                        # (C, HW), stays in VMEM

        # conv2 + folded BN2 + residual add + ReLU.
        build_cols(h1)
        y = jnp.dot(w2_ref[...], col_ref[...],
                    preferred_element_type=jnp.float32) + b2_ref[...]
        y = jnp.maximum(y + x_cf, 0.0)
        o_ref[0] = y.astype(o_ref.dtype)                 # lane-dense store

    return kernel


def _fold_bn(conv_w, bn, eps=_EPS):
    """Fold eval-mode BatchNorm into the conv (fold done in f32).
    conv_w: (Cout, Cin, 3, 3) -> w2d (Cout, 9*Cin), column order (ky, kx, ci),
    plus bias (Cout, 1)."""
    bn_w, bn_b, bn_rm, bn_rv = bn
    scale = bn_w * jax.lax.rsqrt(bn_rv + eps)                        # (Cout,)
    w_f = conv_w.astype(jnp.float32) * scale[:, None, None, None]
    b_f = bn_b - bn_rm * scale
    Cout, Cin = conv_w.shape[0], conv_w.shape[1]
    w2d = jnp.transpose(w_f, (0, 2, 3, 1)).reshape(Cout, 9 * Cin)
    return w2d, b_f.reshape(Cout, 1).astype(jnp.float32)


def _tap_masks(H, W):
    """(9, H*W) {0,1} float32: validity of each tap's flat-shifted read."""
    h = jnp.arange(H, dtype=jnp.int32)[:, None]
    w = jnp.arange(W, dtype=jnp.int32)[None, :]
    rows = []
    for ky in range(3):
        for kx in range(3):
            dy, dx = ky - 1, kx - 1
            ok = ((h + dy >= 0) & (h + dy < H) & (w + dx >= 0) & (w + dx < W))
            rows.append(ok.reshape(H * W))
    return jnp.stack(rows, axis=0).astype(jnp.float32)


@jax.jit
def basic_block(x, conv1_w, bn1, conv2_w, bn2):
    """BasicBlock forward (stride=1, downsample=None, eval-mode BN). x: (N,C,H,W)."""
    # TODO(synk): stride>1 / downsample projection path not implemented.
    # TODO(synk): training-mode BN (batch statistics) is not computed in-kernel.
    # TODO(synk): for large feature maps (e.g. 56x56x64+) add a spatial grid axis
    #             (row strips + 1-row halo) to bound VMEM on v7x/v5e, and cast
    #             activations/folded weights to bf16 for inference.
    N, C, H, W = x.shape
    assert conv1_w.shape == (C, C, 3, 3) and conv2_w.shape == (C, C, 3, 3), (
        "no-downsample BasicBlock requires inplanes == planes")
    HW = H * W

    w1, b1 = _fold_bn(conv1_w, bn1)
    w2, b2 = _fold_bn(conv2_w, bn2)
    masks = _tap_masks(H, W)

    x2d = x.reshape(N, C, HW)            # free: merges minor dims, no copy

    nbytes = lambda a: a.size * a.dtype.itemsize
    cost = pl.CostEstimate(
        flops=2 * 2 * N * HW * (9 * C) * C,              # two 3x3 convs
        transcendentals=0,
        bytes_accessed=(nbytes(x2d) + nbytes(masks) + nbytes(w1) + nbytes(b1)
                        + nbytes(w2) + nbytes(b2)
                        + N * C * HW * x.dtype.itemsize),
    )

    out2d = pl.pallas_call(
        _make_basic_block_kernel(H, W, C),
        out_shape=jax.ShapeDtypeStruct((N, C, HW), x.dtype),
        grid_spec=pltpu.PrefetchScalarGridSpec(
            num_scalar_prefetch=0,
            grid=(N,),
            in_specs=[
                pl.BlockSpec((1, C, HW), lambda n: (n, 0, 0)),   # x (per image)
                pl.BlockSpec((9, HW), lambda n: (0, 0)),         # tap masks
                pl.BlockSpec((C, 9 * C), lambda n: (0, 0)),      # w1 (BN folded)
                pl.BlockSpec((C, 1), lambda n: (0, 0)),          # b1
                pl.BlockSpec((C, 9 * C), lambda n: (0, 0)),      # w2 (BN folded)
                pl.BlockSpec((C, 1), lambda n: (0, 0)),          # b2
            ],
            out_specs=pl.BlockSpec((1, C, HW), lambda n: (n, 0, 0)),
            scratch_shapes=[
                pltpu.VMEM((C, HW + 2 * W + 2), jnp.float32),    # shifted rows
                pltpu.VMEM((9 * C, HW), jnp.float32),            # im2col, K=9C
            ],
        ),
        compiler_params=pltpu.CompilerParams(
            dimension_semantics=("parallel",),
            vmem_limit_bytes=32 * 1024 * 1024,
        ),
        cost_estimate=cost,
    )(x2d, masks, w1, b1, w2, b2)

    return out2d.reshape(N, C, H, W)     # free: splits minor dim, no copy


def _ref_basic_block(x, conv1_w, bn1, conv2_w, bn2, eps=_EPS):
    """Pure-JAX reference mirroring the PyTorch forward (eval-mode BN)."""

    def conv(v, w):
        return jax.lax.conv_general_dilated(
            v, w, window_strides=(1, 1), padding=((1, 1), (1, 1)),
            dimension_numbers=("NCHW", "OIHW", "NCHW"),
            precision=jax.lax.Precision.HIGHEST)

    def bn(v, p):
        w, b, rm, rv = p
        s = w * jax.lax.rsqrt(rv + eps)
        return v * s.reshape(1, -1, 1, 1) + (b - rm * s).reshape(1, -1, 1, 1)

    out = jax.nn.relu(bn(conv(x, conv1_w), bn1))
    out = bn(conv(out, conv2_w), bn2)
    return jax.nn.relu(out + x)


if __name__ == "__main__":
    key = jax.random.PRNGKey(0)
    N, C, H, W = 2, 4, 16, 16
    ks = jax.random.split(key, 11)

    x = jax.random.normal(ks[0], (N, C, H, W), jnp.float32)
    conv1_w = 0.2 * jax.random.normal(ks[1], (C, C, 3, 3), jnp.float32)
    conv2_w = 0.2 * jax.random.normal(ks[2], (C, C, 3, 3), jnp.float32)
    bn1 = (
        1.0 + 0.1 * jax.random.normal(ks[3], (C,), jnp.float32),   # weight
        0.1 * jax.random.normal(ks[4], (C,), jnp.float32),         # bias
        0.1 * jax.random.normal(ks[5], (C,), jnp.float32),         # running_mean
        1.0 + 0.05 * jnp.abs(jax.random.normal(ks[6], (C,), jnp.float32)),  # running_var
    )
    bn2 = (
        1.0 + 0.1 * jax.random.normal(ks[7], (C,), jnp.float32),
        0.1 * jax.random.normal(ks[8], (C,), jnp.float32),
        0.1 * jax.random.normal(ks[9], (C,), jnp.float32),
        1.0 + 0.05 * jnp.abs(jax.random.normal(ks[10], (C,), jnp.float32)),
    )

    out = basic_block(x, conv1_w, bn1, conv2_w, bn2)
    out = jax.block_until_ready(out)

    ref = _ref_basic_block(x, conv1_w, bn1, conv2_w, bn2)
    err = float(jnp.max(jnp.abs(out - ref)))

    assert out.shape == (N, C, H, W)
    assert jnp.allclose(out, ref, atol=1e-3, rtol=1e-3), err
    print("KERNEL_OK")
</pallas_src>

<mosaic_0001>
module attributes {stable_mosaic.version = 11 : i64} {
  func.func @kernel(%arg0: i32, %arg1: memref<1x4x256xf32, #tpu.memory_space<vmem>>, %arg2: memref<9x256xf32, #tpu.memory_space<vmem>>, %arg3: memref<4x36xf32, #tpu.memory_space<vmem>>, %arg4: memref<4x1xf32, #tpu.memory_space<vmem>>, %arg5: memref<4x36xf32, #tpu.memory_space<vmem>>, %arg6: memref<4x1xf32, #tpu.memory_space<vmem>>, %arg7: memref<1x4x256xf32, #tpu.memory_space<vmem>>, %arg8: memref<4x290xf32, #tpu.memory_space<vmem>>, %arg9: memref<36x256xf32, #tpu.memory_space<vmem>>) attributes {dimension_semantics = [#tpu.dimension_semantics<parallel>], iteration_bounds = array<i64: 2>, scalar_prefetch = 0 : i64, scratch_operands = 2 : i64, tpu.core_type = #tpu.core_type<tc>, window_params = [{transform_indices = @transform_0, window_bounds = array<i64: 1, 4, 256>}, {pipeline_mode = #tpu.pipeline_mode<synchronous>, transform_indices = @transform_1, window_bounds = array<i64: 9, 256>}, {pipeline_mode = #tpu.pipeline_mode<synchronous>, transform_indices = @transform_2, window_bounds = array<i64: 4, 36>}, {pipeline_mode = #tpu.pipeline_mode<synchronous>, transform_indices = @transform_3, window_bounds = array<i64: 4, 1>}, {pipeline_mode = #tpu.pipeline_mode<synchronous>, transform_indices = @transform_4, window_bounds = array<i64: 4, 36>}, {pipeline_mode = #tpu.pipeline_mode<synchronous>, transform_indices = @transform_5, window_bounds = array<i64: 4, 1>}, {transform_indices = @transform_6, window_bounds = array<i64: 1, 4, 256>}]} {
    %c0 = arith.constant 0 : index
    %c0_0 = arith.constant 0 : index
    %c0_1 = arith.constant 0 : index
    %0 = vector.load %arg1[%c0, %c0_0, %c0_1] : memref<1x4x256xf32, #tpu.memory_space<vmem>>, vector<1x4x256xf32>
    %1 = vector.shape_cast %0 : vector<1x4x256xf32> to vector<4x256xf32>
    %cst = arith.constant 0.000000e+00 : f32
    %2 = vector.broadcast %cst : f32 to vector<4x290xf32>
    %c0_2 = arith.constant 0 : index
    %c0_3 = arith.constant 0 : index
    %3 = vector.load %arg8[%c0_2, %c0_3] : memref<4x290xf32, #tpu.memory_space<vmem>>, vector<4x290xf32>
    tpu.vector_store %arg8[%c0_2, %c0_3], %2 {strides = array<i32>} : memref<4x290xf32, #tpu.memory_space<vmem>>, vector<4x290xf32>,
    %c0_4 = arith.constant 0 : index
    %c17 = arith.constant 17 : index
    %4 = vector.load %arg8[%c0_4, %c17] : memref<4x290xf32, #tpu.memory_space<vmem>>, vector<4x256xf32>
    tpu.vector_store %arg8[%c0_4, %c17], %1 {strides = array<i32>} : memref<4x290xf32, #tpu.memory_space<vmem>>, vector<4x256xf32>,
    %c0_5 = arith.constant 0 : index
    %c0_6 = arith.constant 0 : index
    %5 = vector.load %arg8[%c0_5, %c0_6] : memref<4x290xf32, #tpu.memory_space<vmem>>, vector<4x256xf32>
    %c0_7 = arith.constant 0 : index
    %c0_8 = arith.constant 0 : index
    %6 = vector.load %arg2[%c0_7, %c0_8] : memref<9x256xf32, #tpu.memory_space<vmem>>, vector<1x256xf32>
    %7 = vector.broadcast %6 : vector<1x256xf32> to vector<4x256xf32>
    %8 = arith.mulf %5, %7 : vector<4x256xf32>
    %c0_9 = arith.constant 0 : index
    %c0_10 = arith.constant 0 : index
    %9 = vector.load %arg9[%c0_9, %c0_10] : memref<36x256xf32, #tpu.memory_space<vmem>>, vector<4x256xf32>
    tpu.vector_store %arg9[%c0_9, %c0_10], %8 {strides = array<i32>} : memref<36x256xf32, #tpu.memory_space<vmem>>, vector<4x256xf32>,
    %c0_11 = arith.constant 0 : index
    %c1 = arith.constant 1 : index
    %10 = vector.load %arg8[%c0_11, %c1] : memref<4x290xf32, #tpu.memory_space<vmem>>, vector<4x256xf32>
    %c1_12 = arith.constant 1 : index
    %c0_13 = arith.constant 0 : index
    %11 = vector.load %arg2[%c1_12, %c0_13] : memref<9x256xf32, #tpu.memory_space<vmem>>, vector<1x256xf32>
    %12 = vector.broadcast %11 : vector<1x256xf32> to vector<4x256xf32>
    %13 = arith.mulf %10, %12 : vector<4x256xf32>
    %c4 = arith.constant 4 : index
    %c0_14 = arith.constant 0 : index
    %14 = vector.load %arg9[%c4, %c0_14] : memref<36x256xf32, #tpu.memory_space<vmem>>, vector<4x256xf32>
    tpu.vector_store %arg9[%c4, %c0_14], %13 {strides = array<i32>} : memref<36x256xf32, #tpu.memory_space<vmem>>, vector<4x256xf32>,
    %c0_15 = arith.constant 0 : index
    %c2 = arith.constant 2 : index
    %15 = vector.load %arg8[%c0_15, %c2] : memref<4x290xf32, #tpu.memory_space<vmem>>, vector<4x256xf32>
    %c2_16 = arith.constant 2 : index
    %c0_17 = arith.constant 0 : index
    %16 = vector.load %arg2[%c2_16, %c0_17] : memref<9x256xf32, #tpu.memory_space<vmem>>, vector<1x256xf32>
    %17 = vector.broadcast %16 : vector<1x256xf32> to vector<4x256xf32>
    %18 = arith.mulf %15, %17 : vector<4x256xf32>
    %c8 = arith.constant 8 : index
    %c0_18 = arith.constant 0 : index
    %19 = vector.load %arg9[%c8, %c0_18] : memref<36x256xf32, #tpu.memory_space<vmem>>, vector<4x256xf32>
    tpu.vector_store %arg9[%c8, %c0_18], %18 {strides = array<i32>} : memref<36x256xf32, #tpu.memory_space<vmem>>, vector<4x256xf32>,
    %c0_19 = arith.constant 0 : index
    %c16 = arith.constant 16 : index
    %20 = vector.load %arg8[%c0_19, %c16] : memref<4x290xf32, #tpu.memory_space<vmem>>, vector<4x256xf32>
    %c3 = arith.constant 3 : index
    %c0_20 = arith.constant 0 : index
    %21 = vector.load %arg2[%c3, %c0_20] : memref<9x256xf32, #tpu.memory_space<vmem>>, vector<1x256xf32>
    %22 = vector.broadcast %21 : vector<1x256xf32> to vector<4x256xf32>
    %23 = arith.mulf %20, %22 : vector<4x256xf32>
    %c12 = arith.constant 12 : index
    %c0_21 = arith.constant 0 : index
    %24 = vector.load %arg9[%c12, %c0_21] : memref<36x256xf32, #tpu.memory_space<vmem>>, vector<4x256xf32>
    tpu.vector_store %arg9[%c12, %c0_21], %23 {strides = array<i32>} : memref<36x256xf32, #tpu.memory_space<vmem>>, vector<4x256xf32>,
    %c0_22 = arith.constant 0 : index
    %c17_23 = arith.constant 17 : index
    %25 = vector.load %arg8[%c0_22, %c17_23] : memref<4x290xf32, #tpu.memory_space<vmem>>, vector<4x256xf32>
    %c4_24 = arith.constant 4 : index
    %c0_25 = arith.constant 0 : index
    %26 = vector.load %arg2[%c4_24, %c0_25] : memref<9x256xf32, #tpu.memory_space<vmem>>, vector<1x256xf32>
    %27 = vector.broadcast %26 : vector<1x256xf32> to vector<4x256xf32>
    %28 = arith.mulf %25, %27 : vector<4x256xf32>
    %c16_26 = arith.constant 16 : index
    %c0_27 = arith.constant 0 : index
    %29 = vector.load %arg9[%c16_26, %c0_27] : memref<36x256xf32, #tpu.memory_space<vmem>>, vector<4x256xf32>
    tpu.vector_store %arg9[%c16_26, %c0_27], %28 {strides = array<i32>} : memref<36x256xf32, #tpu.memory_space<vmem>>, vector<4x256xf32>,
    %c0_28 = arith.constant 0 : index
    %c18 = arith.constant 18 : index
    %30 = vector.load %arg8[%c0_28, %c18] : memref<4x290xf32, #tpu.memory_space<vmem>>, vector<4x256xf32>
    %c5 = arith.constant 5 : index
    %c0_29 = arith.constant 0 : index
    %31 = vector.load %arg2[%c5, %c0_29] : memref<9x256xf32, #tpu.memory_space<vmem>>, vector<1x256xf32>
    %32 = vector.broadcast %31 : vector<1x256xf32> to vector<4x256xf32>
    %33 = arith.mulf %30, %32 : vector<4x256xf32>
    %c20 = arith.constant 20 : index
    %c0_30 = arith.constant 0 : index
    %34 = vector.load %arg9[%c20, %c0_30] : memref<36x256xf32, #tpu.memory_space<vmem>>, vector<4x256xf32>
    tpu.vector_store %arg9[%c20, %c0_30], %33 {strides = array<i32>} : memref<36x256xf32, #tpu.memory_space<vmem>>, vector<4x256xf32>,
    %c0_31 = arith.constant 0 : index
    %c32 = arith.constant 32 : index
    %35 = vector.load %arg8[%c0_31, %c32] : memref<4x290xf32, #tpu.memory_space<vmem>>, vector<4x256xf32>
    %c6 = arith.constant 6 : index
    %c0_32 = arith.constant 0 : index
    %36 = vector.load %arg2[%c6, %c0_32] : memref<9x256xf32, #tpu.memory_space<vmem>>, vector<1x256xf32>
    %37 = vector.broadcast %36 : vector<1x256xf32> to vector<4x256xf32>
    %38 = arith.mulf %35, %37 : vector<4x256xf32>
    %c24 = arith.constant 24 : index
    %c0_33 = arith.constant 0 : index
    %39 = vector.load %arg9[%c24, %c0_33] : memref<36x256xf32, #tpu.memory_space<vmem>>, vector<4x256xf32>
    tpu.vector_store %arg9[%c24, %c0_33], %38 {strides = array<i32>} : memref<36x256xf32, #tpu.memory_space<vmem>>, vector<4x256xf32>,
    %c0_34 = arith.constant 0 : index
    %c33 = arith.constant 33 : index
    %40 = vector.load %arg8[%c0_34, %c33] : memref<4x290xf32, #tpu.memory_space<vmem>>, vector<4x256xf32>
    %c7 = arith.constant 7 : index
    %c0_35 = arith.constant 0 : index
    %41 = vector.load %arg2[%c7, %c0_35] : memref<9x256xf32, #tpu.memory_space<vmem>>, vector<1x256xf32>
    %42 = vector.broadcast %41 : vector<1x256xf32> to vector<4x256xf32>
    %43 = arith.mulf %40, %42 : vector<4x256xf32>
    %c28 = arith.constant 28 : index
    %c0_36 = arith.constant 0 : index
    %44 = vector.load %arg9[%c28, %c0_36] : memref<36x256xf32, #tpu.memory_space<vmem>>, vector<4x256xf32>
    tpu.vector_store %arg9[%c28, %c0_36], %43 {strides = array<i32>} : memref<36x256xf32, #tpu.memory_space<vmem>>, vector<4x256xf32>,
    %c0_37 = arith.constant 0 : index
    %c34 = arith.constant 34 : index
    %45 = vector.load %arg8[%c0_37, %c34] : memref<4x290xf32, #tpu.memory_space<vmem>>, vector<4x256xf32>
    %c8_38 = arith.constant 8 : index
    %c0_39 = arith.constant 0 : index
    %46 = vector.load %arg2[%c8_38, %c0_39] : memref<9x256xf32, #tpu.memory_space<vmem>>, vector<1x256xf32>
    %47 = vector.broadcast %46 : vector<1x256xf32> to vector<4x256xf32>
    %48 = arith.mulf %45, %47 : vector<4x256xf32>
    %c32_40 = arith.constant 32 : index
    %c0_41 = arith.constant 0 : index
    %49 = vector.load %arg9[%c32_40, %c0_41] : memref<36x256xf32, #tpu.memory_space<vmem>>, vector<4x256xf32>
    tpu.vector_store %arg9[%c32_40, %c0_41], %48 {strides = array<i32>} : memref<36x256xf32, #tpu.memory_space<vmem>>, vector<4x256xf32>,
    %c0_42 = arith.constant 0 : index
    %c0_43 = arith.constant 0 : index
    %50 = vector.load %arg3[%c0_42, %c0_43] : memref<4x36xf32, #tpu.memory_space<vmem>>, vector<4x36xf32>
    %c0_44 = arith.constant 0 : index
    %c0_45 = arith.constant 0 : index
    %51 = vector.load %arg9[%c0_44, %c0_45] : memref<36x256xf32, #tpu.memory_space<vmem>>, vector<36x256xf32>
    %cst_46 = arith.constant dense<0.000000e+00> : vector<4x256xf32>
    %52 = tpu.matmul %50, %51, %cst_46 {dimension_numbers = #tpu.dot_dimension_numbers<[1], [0], [0], [1], [0, 0, 1, 1], [], []>} : vector<4x36xf32>, vector<36x256xf32>, vector<4x256xf32> -> vector<4x256xf32>
    %c0_47 = arith.constant 0 : index
    %c0_48 = arith.constant 0 : index
    %53 = vector.load %arg4[%c0_47, %c0_48] : memref<4x1xf32, #tpu.memory_space<vmem>>, vector<4x1xf32>
    %54 = vector.broadcast %53 : vector<4x1xf32> to vector<4x256xf32>
    %55 = arith.addf %52, %54 : vector<4x256xf32>
    %cst_49 = arith.constant 0.000000e+00 : f32
    %56 = vector.broadcast %cst_49 : f32 to vector<4x256xf32>
    %57 = arith.maximumf %55, %56 : vector<4x256xf32>
    %cst_50 = arith.constant 0.000000e+00 : f32
    %58 = vector.broadcast %cst_50 : f32 to vector<4x290xf32>
    %c0_51 = arith.constant 0 : index
    %c0_52 = arith.constant 0 : index
    %59 = vector.load %arg8[%c0_51, %c0_52] : memref<4x290xf32, #tpu.memory_space<vmem>>, vector<4x290xf32>
    tpu.vector_store %arg8[%c0_51, %c0_52], %58 {strides = array<i32>} : memref<4x290xf32, #tpu.memory_space<vmem>>, vector<4x290xf32>,
    %c0_53 = arith.constant 0 : index
    %c17_54 = arith.constant 17 : index
    %60 = vector.load %arg8[%c0_53, %c17_54] : memref<4x290xf32, #tpu.memory_space<vmem>>, vector<4x256xf32>
    tpu.vector_store %arg8[%c0_53, %c17_54], %57 {strides = array<i32>} : memref<4x290xf32, #tpu.memory_space<vmem>>, vector<4x256xf32>,
    %c0_55 = arith.constant 0 : index
    %c0_56 = arith.constant 0 : index
    %61 = vector.load %arg8[%c0_55, %c0_56] : memref<4x290xf32, #tpu.memory_space<vmem>>, vector<4x256xf32>
    %c0_57 = arith.constant 0 : index
    %c0_58 = arith.constant 0 : index
    %62 = vector.load %arg2[%c0_57, %c0_58] : memref<9x256xf32, #tpu.memory_space<vmem>>, vector<1x256xf32>
    %63 = vector.broadcast %62 : vector<1x256xf32> to vector<4x256xf32>
    %64 = arith.mulf %61, %63 : vector<4x256xf32>
    %c0_59 = arith.constant 0 : index
    %c0_60 = arith.constant 0 : index
    %65 = vector.load %arg9[%c0_59, %c0_60] : memref<36x256xf32, #tpu.memory_space<vmem>>, vector<4x256xf32>
    tpu.vector_store %arg9[%c0_59, %c0_60], %64 {strides = array<i32>} : memref<36x256xf32, #tpu.memory_space<vmem>>, vector<4x256xf32>,
    %c0_61 = arith.constant 0 : index
    %c1_62 = arith.constant 1 : index
    %66 = vector.load %arg8[%c0_61, %c1_62] : memref<4x290xf32, #tpu.memory_space<vmem>>, vector<4x256xf32>
    %c1_63 = arith.constant 1 : index
    %c0_64 = arith.constant 0 : index
    %67 = vector.load %arg2[%c1_63, %c0_64] : memref<9x256xf32, #tpu.memory_space<vmem>>, vector<1x256xf32>
    %68 = vector.broadcast %67 : vector<1x256xf32> to vector<4x256xf32>
    %69 = arith.mulf %66, %68 : vector<4x256xf32>
    %c4_65 = arith.constant 4 : index
    %c0_66 = arith.constant 0 : index
    %70 = vector.load %arg9[%c4_65, %c0_66] : memref<36x256xf32, #tpu.memory_space<vmem>>, vector<4x256xf32>
    tpu.vector_store %arg9[%c4_65, %c0_66], %69 {strides = array<i32>} : memref<36x256xf32, #tpu.memory_space<vmem>>, vector<4x256xf32>,
    %c0_67 = arith.constant 0 : index
    %c2_68 = arith.constant 2 : index
    %71 = vector.load %arg8[%c0_67, %c2_68] : memref<4x290xf32, #tpu.memory_space<vmem>>, vector<4x256xf32>
    %c2_69 = arith.constant 2 : index
    %c0_70 = arith.constant 0 : index
    %72 = vector.load %arg2[%c2_69, %c0_70] : memref<9x256xf32, #tpu.memory_space<vmem>>, vector<1x256xf32>
    %73 = vector.broadcast %72 : vector<1x256xf32> to vector<4x256xf32>
    %74 = arith.mulf %71, %73 : vector<4x256xf32>
    %c8_71 = arith.constant 8 : index
    %c0_72 = arith.constant 0 : index
    %75 = vector.load %arg9[%c8_71, %c0_72] : memref<36x256xf32, #tpu.memory_space<vmem>>, vector<4x256xf32>
    tpu.vector_store %arg9[%c8_71, %c0_72], %74 {strides = array<i32>} : memref<36x256xf32, #tpu.memory_space<vmem>>, vector<4x256xf32>,
    %c0_73 = arith.constant 0 : index
    %c16_74 = arith.constant 16 : index
    %76 = vector.load %arg8[%c0_73, %c16_74] : memref<4x290xf32, #tpu.memory_space<vmem>>, vector<4x256xf32>
    %c3_75 = arith.constant 3 : index
    %c0_76 = arith.constant 0 : index
    %77 = vector.load %arg2[%c3_75, %c0_76] : memref<9x256xf32, #tpu.memory_space<vmem>>, vector<1x256xf32>
    %78 = vector.broadcast %77 : vector<1x256xf32> to vector<4x256xf32>
    %79 = arith.mulf %76, %78 : vector<4x256xf32>
    %c12_77 = arith.constant 12 : index
    %c0_78 = arith.constant 0 : index
    %80 = vector.load %arg9[%c12_77, %c0_78] : memref<36x256xf32, #tpu.memory_space<vmem>>, vector<4x256xf32>
    tpu.vector_store %arg9[%c12_77, %c0_78], %79 {strides = array<i32>} : memref<36x256xf32, #tpu.memory_space<vmem>>, vector<4x256xf32>,
    %c0_79 = arith.constant 0 : index
    %c17_80 = arith.constant 17 : index
    %81 = vector.load %arg8[%c0_79, %c17_80] : memref<4x290xf32, #tpu.memory_space<vmem>>, vector<4x256xf32>
    %c4_81 = arith.constant 4 : index
    %c0_82 = arith.constant 0 : index
    %82 = vector.load %arg2[%c4_81, %c0_82] : memref<9x256xf32, #tpu.memory_space<vmem>>, vector<1x256xf32>
    %83 = vector.broadcast %82 : vector<1x256xf32> to vector<4x256xf32>
    %84 = arith.mulf %81, %83 : vector<4x256xf32>
    %c16_83 = arith.constant 16 : index
    %c0_84 = arith.constant 0 : index
    %85 = vector.load %arg9[%c16_83, %c0_84] : memref<36x256xf32, #tpu.memory_space<vmem>>, vector<4x256xf32>
    tpu.vector_store %arg9[%c16_83, %c0_84], %84 {strides = array<i32>} : memref<36x256xf32, #tpu.memory_space<vmem>>, vector<4x256xf32>,
    %c0_85 = arith.constant 0 : index
    %c18_86 = arith.constant 18 : index
    %86 = vector.load %arg8[%c0_85, %c18_86] : memref<4x290xf32, #tpu.memory_space<vmem>>, vector<4x256xf32>
    %c5_87 = arith.constant 5 : index
    %c0_88 = arith.constant 0 : index
    %87 = vector.load %arg2[%c5_87, %c0_88] : memref<9x256xf32, #tpu.memory_space<vmem>>, vector<1x256xf32>
    %88 = vector.broadcast %87 : vector<1x256xf32> to vector<4x256xf32>
    %89 = arith.mulf %86, %88 : vector<4x256xf32>
    %c20_89 = arith.constant 20 : index
    %c0_90 = arith.constant 0 : index
    %90 = vector.load %arg9[%c20_89, %c0_90] : memref<36x256xf32, #tpu.memory_space<vmem>>, vector<4x256xf32>
    tpu.vector_store %arg9[%c20_89, %c0_90], %89 {strides = array<i32>} : memref<36x256xf32, #tpu.memory_space<vmem>>, vector<4x256xf32>,
    %c0_91 = arith.constant 0 : index
    %c32_92 = arith.constant 32 : index
    %91 = vector.load %arg8[%c0_91, %c32_92] : memref<4x290xf32, #tpu.memory_space<vmem>>, vector<4x256xf32>
    %c6_93 = arith.constant 6 : index
    %c0_94 = arith.constant 0 : index
    %92 = vector.load %arg2[%c6_93, %c0_94] : memref<9x256xf32, #tpu.memory_space<vmem>>, vector<1x256xf32>
    %93 = vector.broadcast %92 : vector<1x256xf32> to vector<4x256xf32>
    %94 = arith.mulf %91, %93 : vector<4x256xf32>
    %c24_95 = arith.constant 24 : index
    %c0_96 = arith.constant 0 : index
    %95 = vector.load %arg9[%c24_95, %c0_96] : memref<36x256xf32, #tpu.memory_space<vmem>>, vector<4x256xf32>
    tpu.vector_store %arg9[%c24_95, %c0_96], %94 {strides = array<i32>} : memref<36x256xf32, #tpu.memory_space<vmem>>, vector<4x256xf32>,
    %c0_97 = arith.constant 0 : index
    %c33_98 = arith.constant 33 : index
    %96 = vector.load %arg8[%c0_97, %c33_98] : memref<4x290xf32, #tpu.memory_space<vmem>>, vector<4x256xf32>
    %c7_99 = arith.constant 7 : index
    %c0_100 = arith.constant 0 : index
    %97 = vector.load %arg2[%c7_99, %c0_100] : memref<9x256xf32, #tpu.memory_space<vmem>>, vector<1x256xf32>
    %98 = vector.broadcast %97 : vector<1x256xf32> to vector<4x256xf32>
    %99 = arith.mulf %96, %98 : vector<4x256xf32>
    %c28_101 = arith.constant 28 : index
    %c0_102 = arith.constant 0 : index
    %100 = vector.load %arg9[%c28_101, %c0_102] : memref<36x256xf32, #tpu.memory_space<vmem>>, vector<4x256xf32>
    tpu.vector_store %arg9[%c28_101, %c0_102], %99 {strides = array<i32>} : memref<36x256xf32, #tpu.memory_space<vmem>>, vector<4x256xf32>,
    %c0_103 = arith.constant 0 : index
    %c34_104 = arith.constant 34 : index
    %101 = vector.load %arg8[%c0_103, %c34_104] : memref<4x290xf32, #tpu.memory_space<vmem>>, vector<4x256xf32>
    %c8_105 = arith.constant 8 : index
    %c0_106 = arith.constant 0 : index
    %102 = vector.load %arg2[%c8_105, %c0_106] : memref<9x256xf32, #tpu.memory_space<vmem>>, vector<1x256xf32>
    %103 = vector.broadcast %102 : vector<1x256xf32> to vector<4x256xf32>
    %104 = arith.mulf %101, %103 : vector<4x256xf32>
    %c32_107 = arith.constant 32 : index
    %c0_108 = arith.constant 0 : index
    %105 = vector.load %arg9[%c32_107, %c0_108] : memref<36x256xf32, #tpu.memory_space<vmem>>, vector<4x256xf32>
    tpu.vector_store %arg9[%c32_107, %c0_108], %104 {strides = array<i32>} : memref<36x256xf32, #tpu.memory_space<vmem>>, vector<4x256xf32>,
    %c0_109 = arith.constant 0 : index
    %c0_110 = arith.constant 0 : index
    %106 = vector.load %arg5[%c0_109, %c0_110] : memref<4x36xf32, #tpu.memory_space<vmem>>, vector<4x36xf32>
    %c0_111 = arith.constant 0 : index
    %c0_112 = arith.constant 0 : index
    %107 = vector.load %arg9[%c0_111, %c0_112] : memref<36x256xf32, #tpu.memory_space<vmem>>, vector<36x256xf32>
    %cst_113 = arith.constant dense<0.000000e+00> : vector<4x256xf32>
    %108 = tpu.matmul %106, %107, %cst_113 {dimension_numbers = #tpu.dot_dimension_numbers<[1], [0], [0], [1], [0, 0, 1, 1], [], []>} : vector<4x36xf32>, vector<36x256xf32>, vector<4x256xf32> -> vector<4x256xf32>
    %c0_114 = arith.constant 0 : index
    %c0_115 = arith.constant 0 : index
    %109 = vector.load %arg6[%c0_114, %c0_115] : memref<4x1xf32, #tpu.memory_space<vmem>>, vector<4x1xf32>
    %110 = vector.broadcast %109 : vector<4x1xf32> to vector<4x256xf32>
    %111 = arith.addf %108, %110 : vector<4x256xf32>
    %112 = arith.addf %111, %1 : vector<4x256xf32>
    %cst_116 = arith.constant 0.000000e+00 : f32
    %113 = vector.broadcast %cst_116 : f32 to vector<4x256xf32>
    %114 = arith.maximumf %112, %113 : vector<4x256xf32>
    %c0_117 = arith.constant 0 : index
    %c0_118 = arith.constant 0 : index
    %c0_119 = arith.constant 0 : index
    %115 = vector.load %arg7[%c0_117, %c0_118, %c0_119] : memref<1x4x256xf32, #tpu.memory_space<vmem>>, vector<1x4x256xf32>
    %116 = vector.shape_cast %115 : vector<1x4x256xf32> to vector<4x256xf32>
    %117 = vector.shape_cast %114 : vector<4x256xf32> to vector<1x4x256xf32>
    tpu.vector_store %arg7[%c0_117, %c0_118, %c0_119], %117 {strides = array<i32>} : memref<1x4x256xf32, #tpu.memory_space<vmem>>, vector<1x4x256xf32>,
    return
  }
  func.func @transform_0(%arg0: i32) -> (i32, i32, i32) {
    %c0_i32 = arith.constant 0 : i32
    %c0_i32_0 = arith.constant 0 : i32
    %c0_i32_1 = arith.constant 0 : i32
    return %arg0, %c0_i32, %c0_i32_0 : i32, i32, i32
  }
  func.func @transform_1(%arg0: i32) -> (i32, i32) {
    %c0_i32 = arith.constant 0 : i32
    %c0_i32_0 = arith.constant 0 : i32
    %c0_i32_1 = arith.constant 0 : i32
    return %c0_i32, %c0_i32_0 : i32, i32
  }
  func.func @transform_2(%arg0: i32) -> (i32, i32) {
    %c0_i32 = arith.constant 0 : i32
    %c0_i32_0 = arith.constant 0 : i32
    %c0_i32_1 = arith.constant 0 : i32
    return %c0_i32, %c0_i32_0 : i32, i32
  }
  func.func @transform_3(%arg0: i32) -> (i32, i32) {
    %c0_i32 = arith.constant 0 : i32
    %c0_i32_0 = arith.constant 0 : i32
    %c0_i32_1 = arith.constant 0 : i32
    return %c0_i32, %c0_i32_0 : i32, i32
  }
  func.func @transform_4(%arg0: i32) -> (i32, i32) {
    %c0_i32 = arith.constant 0 : i32
    %c0_i32_0 = arith.constant 0 : i32
    %c0_i32_1 = arith.constant 0 : i32
    return %c0_i32, %c0_i32_0 : i32, i32
  }
  func.func @transform_5(%arg0: i32) -> (i32, i32) {
    %c0_i32 = arith.constant 0 : i32
    %c0_i32_0 = arith.constant 0 : i32
    %c0_i32_1 = arith.constant 0 : i32
    return %c0_i32, %c0_i32_0 : i32, i32
  }
  func.func @transform_6(%arg0: i32) -> (i32, i32, i32) {
    %c0_i32 = arith.constant 0 : i32
    %c0_i32_0 = arith.constant 0 : i32
    %c0_i32_1 = arith.constant 0 : i32
    return %arg0, %c0_i32, %c0_i32_0 : i32, i32, i32
  }
}

</mosaic_0001>

<bundles_post_ra>
// kernel: basic_block.1
= control target key start
LH: loop header
LB: loop body
LE: loop exit
PB: predicated region body
PF: predicated region fallthrough
CT: control target
= control target key end

     0   :  { %s1333_s21 = smov 0   ;;  %s1652_s0 = inlined_call_operand.vmem [shape: f32[2,4,256], index: 0, kind: input, shape index: {}]   ;;  %s1653_s1 = inlined_call_operand.vmem [shape: f32[9,256], index: 1, kind: input, shape index: {}]   ;;  %s1654_s2 = inlined_call_operand.vmem [shape: f32[4,36], index: 2, kind: input, shape index: {}]   ;;  %s1655_s3 = inlined_call_operand.vmem [shape: f32[4,1], index: 3, kind: input, shape index: {}]   ;;  %s1656_s4 = inlined_call_operand.vmem [shape: f32[4,36], index: 4, kind: input, shape index: {}]   ;;  %s1657_s5 = inlined_call_operand.vmem [shape: f32[4,1], index: 5, kind: input, shape index: {}]   ;;  %s1658_s6 = inlined_call_operand.vmem [shape: f32[2,4,256], index: 6, kind: output, shape index: {}]  }
   0x1 LB: > { %s1192_s22 = sadd.s32 4294967295, %s1278_s21   ;;  %p1196_p0 = scmp.ge.s32.totalorder %s1278_s21, 1  ;;  %s1278_s21 = sphi %s1333_s21, %s16_s21  }
   0x2   : > { %p212_p1 = scmp.lt.s32.totalorder %s1278_s21, 3 }
   0x4   : > { %p213_p2 = pnand %p1196_p0, %p212_p1 }
   0x5   : > { %p242_p3 = scmp.lt.s32.totalorder (!%p213_p2), %s1192_s22, 1  ;;  %v273_v0 = vlaneseq (!%p213_p2)  ;;  %v1280_v1 = vmov (!%p213_p2), 0.0   ;;  %vm254_vm0 = vcmask (!%p213_p2), 273408   ;;  %v1201_v3 = vld [vmem:[%s1653_s1 + $0x1] ss:$8 sm:$0x3] (!%p213_p2) }
   0x6   : > { %216 = sbr.rel (%p213_p2) target bundleno = 1057 (0x421), region = 44  ;;  %253 = vst [vmem:[#allocation2] sm:$0xff] (!%p213_p2), %v1280_v1  ;;  %696 = vmatprep.mubr.f32.mxu0 (!%p213_p2), %v1280_v1  ;;  %1119 = vmatprep.mubr.f32.mxu1 (!%p213_p2), %v1280_v1  ;;  %255 = vst.msk [vmem:[#allocation2 + $0x8] sm:$0xf] (!%p213_p2), %vm254_vm0, %v1280_v1  ;;  %s1281_s11 = smov (!%p213_p2), 17   ;;  %vm264_vm1 = vcmask (!%p213_p2), 1043592  }
   0x7   : > { %v274_v2 = vshrl.u32 (!%p213_p2), %v273_v0, 7  ;;  %v1202_v4 = vld [vmem:[%s1653_s1 + $0x2] ss:$8 sm:$0x3] (!%p213_p2)  ;;  %s1282_s16 = smov (!%p213_p2), 1   ;;  %s1283_s17 = smov (!%p213_p2), 2  }
   0x8   : > { %v1203_v5 = vld [vmem:[%s1653_s1 + $0x3] ss:$8 sm:$0x3] (!%p213_p2)  ;;  %v1204_v8 = vld [vmem:[%s1653_s1 + $0x4] ss:$8 sm:$0x3] (!%p213_p2) }
   0x9   : > { %v1358_v6 = vsub.s32 (!%p213_p2), 0, %v274_v2  ;;  %v1360_v7 = vsub.s32 (!%p213_p2), 1, %v274_v2  ;;  %v1206_v17 = vld [vmem:[%s1653_s1 + $0x6] ss:$8 sm:$0x3] (!%p213_p2)  ;;  %s1284_s24 = smov (!%p213_p2), 16  }
   0xa   : > { %v1205_v21 = vld [vmem:[%s1653_s1 + $0x5] ss:$8 sm:$0x3] (!%p213_p2)  ;;  %v1207_v28 = vld [vmem:[%s1653_s1 + $0x7] ss:$8 sm:$0x3] (!%p213_p2) }
   0xb   : > { %v297_v10 = vrot.slane (!%p213_p2), %v1201_v3, %v1358_v6  ;;  %v301_v11 = vrot.slane (!%p213_p2), %v1201_v3, %v1360_v7  ;;  %v337_v12 = vrot.slane (!%p213_p2), %v1202_v4, %v1358_v6  ;;  %v341_v13 = vrot.slane (!%p213_p2), %v1202_v4, %v1360_v7  ;;  %v1208_v29 = vld [vmem:[%s1653_s1 + $0x10] ss:$8 sm:$0x3] (!%p213_p2)  ;;  %s1285_s25 = smov (!%p213_p2), 32   ;;  %s1286_s26 = smov (!%p213_p2), 18  }
   0xc   : > { %v376_v14 = vrot.slane (!%p213_p2), %v1203_v5, %v1358_v6  ;;  %v380_v15 = vrot.slane (!%p213_p2), %v1203_v5, %v1360_v7  ;;  %v416_v16 = vrot.slane (!%p213_p2), %v1204_v8, %v1358_v6  ;;  %v420_v20 = vrot.slane (!%p213_p2), %v1204_v8, %v1360_v7  ;;  %s1287_s27 = smov (!%p213_p2), 33   ;;  %s1288_s28 = smov (!%p213_p2), 34   ;;  %v271_v44 = vld [vmem:[%s1653_s1] ss:$8 sm:$0x3] (!%p213_p2) }
   0xd   : > { %s1676_s22 = smov (!%p242_p3, %s1192_s22), 1  ;;  %v302_v18 = vcombine.low %v297_v10, %v301_v11  ;;  %v342_v19 = vcombine.low %v337_v12, %v341_v13  ;;  %v494_v23 = vrot.slane %v1206_v17, %v1358_v6  ;;  %v498_v24 = vrot.slane %v1206_v17, %v1360_v7  ;;  %s1289_s8 = smov 126  }
   0xe   : > { %s1663_s29 = sshll.u32 %s1676_s22, 3  ;;  %v381_v22 = vcombine.low %v376_v14, %v380_v15  ;;  %v421_v25 = vcombine.low %v416_v16, %v420_v20  ;;  %v454_v26 = vrot.slane %v1205_v21, %v1358_v6  ;;  %v458_v27 = vrot.slane %v1205_v21, %v1360_v7  ;;  %s1290_s9 = smov 111  }
   0xf   : > { %s246_s10 = scalar_lea.vmem %s1652_s0, %s1663_s29  ;;  %303 = vrot.lane.b32.xlu1 %v302_v18, %s1282_s16  ;;  %v499_v30 = vcombine.low %v494_v23, %v498_v24  ;;  %v533_v31 = vrot.slane %v1207_v28, %v1358_v6  ;;  %v537_v32 = vrot.slane %v1207_v28, %v1360_v7  ;;  %v573_v34 = vrot.slane %v1208_v29, %v1358_v6  ;;  %s1292_s12 = smov 110  }
  0x10   : > { %v1370_v9 = vld [vmem:[%s246_s10] sm:$0xff]  ;;  %v459_v33 = vcombine.low %v454_v26, %v458_v27  ;;  %v577_v35 = vrot.slane %v1208_v29, %v1360_v7  ;;  %vm265_vm2 = vcmask 1047556   ;;  %vm260_vm3 = vcmask 138240   ;;  %s1291_s10 = smov 96   ;;  %s1293_s13 = smov 127  }
  0x11   : > { %257 = vrot.lane.b32.xlu0 %v1370_v9, %s1281_s11  ;;  %v538_v36 = vcombine.low %v533_v31, %v537_v32  ;;  %vm268_vm4 = vcmask 134144   ;;  %vm1410_vm5 = vmor %vm265_vm2, %vm264_vm1  ;;  %vm346_vm6 = vcmask 15360   ;;  %v276_v49 = vrot.slane %v271_v44, %v1358_v6  ;;  %s1294_s14 = smov 95   ;;  %s1295_s15 = smov 112  }
  0x12   : > { %v578_v37 = vcombine.low %v573_v34, %v577_v35  ;;  %v280_v50 = vrot.slane %v271_v44, %v1360_v7  ;;  %vm463_vm7 = vcmask 146432   ;;  %vm306_vm8 = vcmask 7168   ;;  %s1296_s18 = smov 94  }
  0x13   : > { %382 = vrot.lane.b32.xlu1 %v381_v22, %s1284_s24  ;;  %vm542_vm9 = vcmask 269312   ;;  %vm385_vm10 = vcmask 130048   ;;  %vm503_vm11 = vcmask 261120   ;;  %vm582_vm12 = vcmask 277504  }
  0x14   : > { %v281_v3 = vcombine.low %v276_v49, %v280_v50  ;;  %v1297_v49 = vmov 0   ;;  %v615_v50 = vld [vmem:[%s1655_s3] sm:$0xf]  ;;  %vm479_vm13 = vcmask 900096   ;;  %vm558_vm14 = vcmask 777216  }
  0x15   : > { %343 = vrot.lane.b32.xlu0 %v342_v19, %s1283_s17  ;;  %1269 = vset.pattern.permute.xlu1 %v1297_v49  ;;  %vm322_vm15 = vcmask 1039360   ;;  %vm1662_vm1 = vcmask 916480   ;;  %vm1660_vm2 = vcmask 908288  }
  0x16   : > { %1270 = vset.pattern.permute.xlu0 %v1297_v49 }
  0x17   : > { %500 = vrot.lane.b32.xlu1 %v499_v30, %s1285_s25 }
  0x19   : > { %422 = vrot.lane.b32.xlu0 %v421_v25, %s1281_s11 }
  0x1b   : > { %539 = vrot.lane.b32.xlu1 %v538_v36, %s1287_s27 }
  0x1d   : > { %460 = vrot.lane.b32.xlu0 %v459_v33, %s1286_s26 }
  0x21   : > { %579 = vrot.lane.b32.xlu0 %v578_v37, %s1288_s28 }
  0x81   : > { %v1416_v42 = vpop.permute.xlu1 %303 }
  0x82   : > { %v305_v11 = vrot.slane %v1416_v42, 4 }
  0x83   : > { %v258_v38 = vpop.permute.xlu0 %257 }
  0x84   : > { %v259_v40 = vrot.slane %v258_v38, 4  ;;  %v307_v16 = vsel %vm306_vm8, %v305_v11, %v1416_v42 }
  0x85   : > { %v1423_v45 = vpop.permute.xlu1 %382 }
  0x86   : > { %v261_v41 = vsel %vm260_vm3, %v259_v40, %v258_v38  ;;  %269 = vst.msk [vmem:[#allocation2 + $0x8] sm:$0xf] %vm268_vm4, %v259_v40  ;;  %v384_v14 = vrot.slane %v1423_v45, 4 }
  0x87   : > { %267 = vst.msk [vmem:[#allocation2] sm:$0xff] %vm1410_vm5, %v261_v41  ;;  %v344_v43 = vpop.permute.xlu0 %343 }
  0x88   : > { %v345_v47 = vrot.slane %v344_v43, 4  ;;  %v386_v20 = vsel %vm385_vm10, %v384_v14, %v1423_v45 }
  0x89   : > { %v501_v57 = vpop.permute.xlu1 %500 }
  0x8a   : > { %v502_v0 = vrot.slane %v501_v57, 4  ;;  %v347_v4 = vsel %vm346_vm6, %v345_v47, %v344_v43 }
  0x8b   : > { %v423_v46 = vpop.permute.xlu0 %422 }
  0x8c   : > { %v424_v48 = vrot.slane %v423_v46, 4  ;;  %v504_v26 = vsel %vm503_vm11, %v502_v0, %v501_v57 }
  0x8d   : > { %v1427_v51 = vld [vmem:[#allocation2 + $0x8] sm:$0xf]  ;;  %v540_v10 = vpop.permute.xlu1 %539 }
  0x8e   : > { %v330_v52 = vld [vmem:[#allocation2 + $0x8] sm:$0xf]  ;;  %v1431_v54 = vld [vmem:[#allocation2] sm:$0xff]  ;;  %v541_v13 = vrot.slane %v540_v10, 4  ;;  %v425_v22 = vsel %vm260_vm3, %v424_v48, %v423_v46  ;;  %v311_v29 = vmul.f32 %v305_v11, %v1427_v51 }
  0x8f   : > { %v1429_v53 = vld [vmem:[#allocation2 + $0x8] sm:$0xf]  ;;  %v351_v55 = vmul.f32 %v345_v47, %v330_v52  ;;  %v461_v60 = vpop.permute.xlu0 %460  ;;  %705 = vst [vmem:[#allocation2] sm:$0xff] %v1280_v1  ;;  %v350_v5 = vmul.f32 %v347_v4, %v1431_v54  ;;  %v310_v19 = vmul.f32 %v307_v16, %v1431_v54  ;;  %v389_v23 = vmul.f32 %v386_v20, %v1431_v54 }
  0x90   : > { %v409_v56 = vld [vmem:[#allocation2 + $0x8] sm:$0xf]  ;;  %v462_v2 = vrot.slane %v461_v60, 4  ;;  %v543_v17 = vsel %vm542_vm9, %v541_v13, %v540_v10  ;;  %v428_v25 = vmul.f32 %v425_v22, %v1431_v54  ;;  %v507_v30 = vmul.f32 %v504_v26, %v1431_v54 }
  0x91   : > { %v487_v58 = vld [vmem:[#allocation2 + $0x8] sm:$0xf]  ;;  %v429_v63 = vmul.f32 %v424_v48, %v409_v56  ;;  %359 = vrot.lane.b32.xlu0 %v351_v55, %s1289_s8  ;;  %v546_v21 = vmul.f32 %v543_v17, %v1431_v54  ;;  %v390_v32 = vmul.f32 %v384_v14, %v1429_v53  ;;  %v315_v33 = vcombine.low %v311_v29, %v311_v29 }
  0x92   : > { %v447_v59 = vld [vmem:[#allocation2 + $0x8] sm:$0xf]  ;;  %v508_v8 = vmul.f32 %v502_v0, %v487_v58  ;;  %v464_v12 = vsel %vm463_vm7, %v462_v2, %v461_v60  ;;  %v354_v35 = vcombine.high %v350_v5, %v350_v5  ;;  %v314_v38 = vcombine.low %v310_v19, %v310_v19 }
  0x93   : > { %v526_v61 = vld [vmem:[#allocation2 + $0x8] sm:$0xf]  ;;  %437 = vrot.lane.b32.xlu1 %v429_v63, %s1290_s9  ;;  %v467_v15 = vmul.f32 %v464_v12, %v1431_v54  ;;  %v468_v24 = vmul.f32 %v462_v2, %v447_v59  ;;  %v580_v34 = vpop.permute.xlu0 %579  ;;  %v394_v36 = vcombine.low %v390_v32, %v390_v32  ;;  %v432_v40 = vcombine.high %v428_v25, %v428_v25 }
  0x94   : > { %v1433_v62 = vld [vmem:[#allocation2 + $0x8] sm:$0xf]  ;;  %v547_v27 = vmul.f32 %v541_v13, %v526_v61  ;;  %v581_v37 = vrot.slane %v580_v34, 4  ;;  %v393_v42 = vcombine.low %v389_v23, %v389_v23  ;;  %v511_v44 = vcombine.high %v507_v30, %v507_v30 }
  0x95   : > { %706 = vst.msk [vmem:[#allocation2 + $0x8] sm:$0xf] %vm254_vm0, %v1280_v1  ;;  %355 = vrot.lane.b32.xlu0 %v350_v5, %s1289_s8  ;;  %v283_v1 = vmul.f32 %v281_v3, %v1431_v54  ;;  %v472_v28 = vcombine.low %v468_v24, %v468_v24  ;;  %v471_v45 = vcombine.low %v467_v15, %v467_v15  ;;  %vm1659_vm0 = vcmask 1031168  }
  0x96   : > { %v551_v31 = vcombine.low %v547_v27, %v547_v27  ;;  %v583_v41 = vsel %vm582_vm12, %v581_v37, %v580_v34  ;;  %v550_v47 = vcombine.low %v546_v21, %v546_v21  ;;  %v587_v48 = vmul.f32 %v581_v37, %v1433_v62 }
  0x97   : > { %516 = vrot.lane.b32.xlu1 %v508_v8, %s1291_s10  ;;  %287 = vst [vmem:[#allocation3] sm:$0xf] %v283_v1  ;;  %v285_v18 = vcombine.high %v283_v1, %v283_v1  ;;  %v586_v43 = vmul.f32 %v583_v41, %v1431_v54 }
  0x99   : > { %475 = vrot.lane.b32.xlu0 %v467_v15, %s1292_s12  ;;  %288 = vst [vmem:[#allocation3 + $0x8] sm:$0xf] %v285_v18  ;;  %v590_v46 = vcombine.high %v586_v43, %v586_v43 }
  0x9b   : > { %318 = vrot.lane.b32.xlu1 %v310_v19, %s1293_s13 }
  0x9d   : > { %554 = vrot.lane.b32.xlu0 %v546_v21, %s1294_s14 }
  0x9f   : > { %397 = vrot.lane.b32.xlu1 %v389_v23, %s1295_s15 }
  0xa1   : > { %433 = vrot.lane.b32.xlu0 %v428_v25, %s1290_s9 }
  0xa3   : > { %477 = vrot.lane.b32.xlu1 %v472_v28, %s1292_s12 }
  0xa5   : > { %512 = vrot.lane.b32.xlu0 %v507_v30, %s1291_s10 }
  0xa7   : > { %556 = vrot.lane.b32.xlu1 %v551_v31, %s1294_s14 }
  0xa9   : > { %320 = vrot.lane.b32.xlu0 %v315_v33, %s1293_s13 }
  0xab   : > { %357 = vrot.lane.b32.xlu1 %v354_v35, %s1289_s8 }
  0xad   : > { %399 = vrot.lane.b32.xlu0 %v394_v36, %s1295_s15 }
  0xaf   : > { %316 = vrot.lane.b32.xlu1 %v314_v38, %s1293_s13 }
  0xb1   : > { %435 = vrot.lane.b32.xlu0 %v432_v40, %s1290_s9 }
  0xb3   : > { %395 = vrot.lane.b32.xlu1 %v393_v42, %s1295_s15 }
  0xb5   : > { %514 = vrot.lane.b32.xlu0 %v511_v44, %s1291_s10  ;;  %v604_v44 = vld [vmem:[%s1654_s2] sm:$0xf] }
  0xb7   : > { %473 = vrot.lane.b32.xlu1 %v471_v45, %s1292_s12 }
  0xb9   : > { %593 = vrot.lane.b32.xlu0 %v590_v46, %s1296_s18  ;;  %v1213_v46 = vld [vmem:[%s1653_s1 + $0x2] ss:$8 sm:$0x3] }
  0xbb   : > { %552 = vrot.lane.b32.xlu1 %v550_v47, %s1294_s14  ;;  %v781_v47 = vrot.slane %v1213_v46, %v1358_v6 }
  0xbd   : > { %591 = vrot.lane.b32.xlu0 %v586_v43, %s1296_s18 }
  0xbf   : > { %595 = vrot.lane.b32.xlu1 %v587_v48, %s1296_s18  ;;  %v785_v48 = vrot.slane %v1213_v46, %v1360_v7 }
  0xc1   : > { %v786_v49 = vcombine.low %v781_v47, %v785_v48 }
  0xc3   : > { %618 = vperm.xlu1 %1269, %v615_v50   ;;  %v1214_v50 = vld [vmem:[%s1653_s1 + $0x3] ss:$8 sm:$0x3] }
  0xc7   : > { %787 = vrot.lane.b32.xlu1 %v786_v49, %s1283_s17 }
 0x103   : > { %v360_v51 = vpop.permute.xlu0 %359 }
 0x105   : > { %v438_v52 = vpop.permute.xlu1 %437 }
 0x107   : > { %v356_v53 = vpop.permute.xlu0 %355 }
 0x109   : > { %v517_v54 = vpop.permute.xlu1 %516 }
 0x10b   : > { %v476_v55 = vpop.permute.xlu0 %475 }
 0x10d   : > { %v319_v56 = vpop.permute.xlu1 %318 }
 0x10f   : > { %v555_v57 = vpop.permute.xlu0 %554 }
 0x111   : > { %v398_v58 = vpop.permute.xlu1 %397 }
 0x113   : > { %v434_v59 = vpop.permute.xlu0 %433 }
 0x115   : > { %v478_v60 = vpop.permute.xlu1 %477 }
 0x116   : > { %v481_v61 = vsel %vm479_vm13, %v476_v55, %v478_v60 }
 0x117   : > { %485 = vst [vmem:[#allocation3 + $0x28] sm:$0xf0] %v481_v61  ;;  %v513_v62 = vpop.permute.xlu0 %512 }
 0x119   : > { %v557_v63 = vpop.permute.xlu1 %556 }
 0x11a   : > { %v560_v0 = vsel %vm558_vm14, %v555_v57, %v557_v63 }
 0x11b   : > { %564 = vst [vmem:[#allocation3 + $0x38] sm:$0xf0] %v560_v0  ;;  %v321_v2 = vpop.permute.xlu0 %320 }
 0x11c   : > { %v324_v3 = vsel %vm322_vm15, %v319_v56, %v321_v2 }
 0x11d   : > { %v358_v4 = vpop.permute.xlu1 %357  ;;  %328 = vst [vmem:[#allocation3 + $0x8] sm:$0xf0] %v324_v3  ;;  %v1212_v3 = vld [vmem:[%s1653_s1 + $0x1] ss:$8 sm:$0x3] }
 0x11e   : > { %v362_v5 = vsel %vm1659_vm0, %v356_v53, %v358_v4  ;;  %v363_v8 = vsel %vm1659_vm0, %v358_v4, %v360_v51  ;;  %vm1661_vm0 = vcmask 785408   ;;  %v817_v51 = vrot.slane %v1214_v50, %v1358_v6  ;;  %v1217_v53 = vld [vmem:[%s1653_s1 + $0x6] ss:$8 sm:$0x3] }
 0x11f   : > { %366 = vst [vmem:[#allocation3 + $0x10] sm:$0xf] %v362_v5  ;;  %367 = vst [vmem:[#allocation3 + $0x18] sm:$0xf] %v363_v8  ;;  %v400_v10 = vpop.permute.xlu0 %399 }
 0x120   : > { %v403_v11 = vsel %vm1662_vm1, %v398_v58, %v400_v10  ;;  %v744_v10 = vrot.slane %v1212_v3, %v1358_v6 }
 0x121   : > { %v317_v12 = vpop.permute.xlu1 %316  ;;  %407 = vst [vmem:[#allocation3 + $0x18] sm:$0xf0] %v403_v11  ;;  %v748_v11 = vrot.slane %v1212_v3, %v1360_v7 }
 0x122   : > { %v323_v13 = vsel %vm322_vm15, %v317_v12, %v319_v56  ;;  %v931_v56 = vrot.slane %v1217_v53, %v1360_v7  ;;  %v1215_v12 = vld [vmem:[%s1653_s1 + $0x4] ss:$8 sm:$0x3] }
 0x123   : > { %327 = vst [vmem:[#allocation3] sm:$0xf0] %v323_v13  ;;  %v436_v1 = vpop.permute.xlu0 %435 }
 0x124   : > { %v440_v14 = vsel %vm1660_vm2, %v434_v59, %v436_v1  ;;  %v441_v15 = vsel %vm1660_vm2, %v436_v1, %v438_v52  ;;  %v606_v21 = vld [vmem:[#allocation3 + $0x8] sm:$0xff]  ;;  %vm597_vm2 = vcmask 769024   ;;  %v821_v52 = vrot.slane %v1214_v50, %v1360_v7 }
 0x125   : > { %v396_v16 = vpop.permute.xlu1 %395  ;;  %444 = vst [vmem:[#allocation3 + $0x20] sm:$0xf] %v440_v14  ;;  %445 = vst [vmem:[#allocation3 + $0x28] sm:$0xf] %v441_v15  ;;  %v749_v1 = vcombine.low %v744_v10, %v748_v11  ;;  %v854_v14 = vrot.slane %v1215_v12, %v1358_v6  ;;  %v858_v15 = vrot.slane %v1215_v12, %v1360_v7 }
 0x126   : > { %v402_v17 = vsel %vm1662_vm1, %v396_v16, %v398_v58  ;;  %vm621_vm1 = vcmask 293888   ;;  %v1218_v58 = vld [vmem:[%s1653_s1 + $0x7] ss:$8 sm:$0x3] }
 0x127   : > { %406 = vst [vmem:[#allocation3 + $0x10] sm:$0xf0] %v402_v17  ;;  %v515_v18 = vpop.permute.xlu0 %514  ;;  %v963_v59 = vrot.slane %v1218_v58, %v1358_v6  ;;  %v967_v60 = vrot.slane %v1218_v58, %v1360_v7  ;;  %v1216_v16 = vld [vmem:[%s1653_s1 + $0x5] ss:$8 sm:$0x3]  ;;  %v859_v17 = vcombine.low %v854_v14, %v858_v15 }
 0x128   : > { %v519_v19 = vsel %vm1661_vm0, %v513_v62, %v515_v18  ;;  %v520_v20 = vsel %vm1661_vm0, %v515_v18, %v517_v54  ;;  %v608_v22 = vld [vmem:[#allocation3 + $0x18] sm:$0xff]  ;;  %vm625_vm0 = vcmask 1043456   ;;  %v822_v54 = vcombine.low %v817_v51, %v821_v52 }
 0x129   : > { %v474_v23 = vpop.permute.xlu1 %473  ;;  %523 = vst [vmem:[#allocation3 + $0x30] sm:$0xf] %v519_v19  ;;  %524 = vst [vmem:[#allocation3 + $0x38] sm:$0xf] %v520_v20  ;;  %v1227_v24 = vpack.c.bf16 %v608_v22, %v606_v21  ;;  %v968_v61 = vcombine.low %v963_v59, %v967_v60  ;;  %v890_v18 = vrot.slane %v1216_v16, %v1358_v6 }
 0x12a   : > { %v480_v25 = vsel %vm479_vm13, %v474_v23, %v476_v55  ;;  %v605_v29 = vld [vmem:[#allocation3] sm:$0xff]  ;;  %v927_v55 = vrot.slane %v1217_v53, %v1358_v6  ;;  %823 = vrot.lane.b32.xlu1 %v822_v54, %s1284_s24  ;;  %v894_v19 = vrot.slane %v1216_v16, %v1360_v7 }
 0x12b   : > { %484 = vst [vmem:[#allocation3 + $0x20] sm:$0xf0] %v480_v25  ;;  %1228 = vmatprep.subr.bf16.mxu0 %v1227_v24  ;;  %v594_v26 = vpop.permute.xlu0 %593  ;;  %v1219_v20 = vld [vmem:[%s1653_s1 + $0x10] ss:$8 sm:$0x3] }
 0x12c   : > { %v610_v34 = vld [vmem:[#allocation3 + $0x28] sm:$0xff]  ;;  %v895_v21 = vcombine.low %v890_v18, %v894_v19  ;;  %v1000_v22 = vrot.slane %v1219_v20, %v1358_v6  ;;  %v1004_v23 = vrot.slane %v1219_v20, %v1360_v7 }
 0x12d   : > { %v553_v27 = vpop.permute.xlu1 %552 }
 0x12e   : > { %v559_v28 = vsel %vm558_vm14, %v553_v27, %v555_v57  ;;  %v607_v30 = vld [vmem:[#allocation3 + $0x10] sm:$0xff]  ;;  %v932_v57 = vcombine.low %v927_v55, %v931_v56  ;;  %v1005_v24 = vcombine.low %v1000_v22, %v1004_v23 }
 0x12f   : > { %563 = vst [vmem:[#allocation3 + $0x30] sm:$0xf0] %v559_v28  ;;  %v1229_v31 = vpack.c.bf16 %v607_v30, %v605_v29  ;;  %v592_v32 = vpop.permute.xlu0 %591  ;;  %v719_v27 = vld [vmem:[%s1653_s1] ss:$8 sm:$0x3] }
 0x130   : > { %v598_v33 = vsel %vm597_vm2, %v592_v32, %v594_v26  ;;  %v612_v35 = vld [vmem:[#allocation3 + $0x38] sm:$0xff]  ;;  %933 = vrot.lane.b32.xlu1 %v932_v57, %s1285_s25  ;;  %v728_v32 = vrot.slane %v719_v27, %v1360_v7 }
 0x131   : > { %v596_v36 = vpop.permute.xlu1 %595  ;;  %1230 = vmatpush1.bf16.msra.mxu0 %v1229_v31  ;;  %602 = vst [vmem:[#allocation3 + $0x40] sm:$0xf] %v598_v33  ;;  %v1231_v37 = vpack.c.bf16 %v612_v35, %v610_v34  ;;  %v724_v31 = vrot.slane %v719_v27, %v1358_v6 }
 0x132   : > { %v599_v38 = vsel %vm597_vm2, %v594_v26, %v596_v36  ;;  %v609_v40 = vld [vmem:[#allocation3 + $0x20] sm:$0xff] }
 0x133   : > { %603 = vst [vmem:[#allocation3 + $0x48] sm:$0xf] %v599_v38  ;;  %1232 = vmatprep.subr.bf16.mxu0 %v1231_v37  ;;  %v729_v34 = vcombine.low %v724_v31, %v728_v32  ;;  %v1040_v32 = vld [vmem:[%s1657_s5] sm:$0xf] }
 0x134   : > { %969 = vrot.lane.b32.xlu1 %v968_v61, %s1287_s27 }
 0x136   : > { %v611_v41 = vld [vmem:[#allocation3 + $0x30] sm:$0xff] }
 0x137   : > { %v1233_v42 = vpack.c.bf16 %v611_v41, %v609_v40 }
 0x138   : > { %v613_v45 = vld [vmem:[#allocation3 + $0x40] sm:$0xf] }
 0x139   : > { %1234 = vmatpush1.bf16.msra.mxu0 %v1233_v42 }
 0x13a   : > { %v614_v43 = vld [vmem:[#allocation3 + $0x48] sm:$0xf] }
 0x13b   : > { %1209 = vmatprep.subr.msk.mxu0 %vm625_vm0, %v614_v43 }
 0x13d   : > { %1210 = vmatpush1.msk.msra.mxu0 %vm625_vm0, %v613_v45 }
 0x13e   : > { %1211 = vmatmul.mubr.msk.f32.vlgmr.msra.gmra.mrb[0].mxu0 %vm621_vm1, %v604_v44 }
 0x142   : > { %v619_v62 = vpop.permute.xlu1 %618 }
 0x146   : > { %v788_v25 = vpop.permute.xlu1 %787 }
 0x147   : > { %v789_v38 = vrot.slane %v788_v25, 4 }
 0x149   : > { %v790_v48 = vsel %vm346_vm6, %v789_v38, %v788_v25 }
 0x19c   : > { %v1563_v29 = vpop.permute.xlu1 %823 }
 0x19d   : > { %v825_v55 = vrot.slane %v1563_v29, 4 }
 0x19f   : > { %v826_v60 = vsel %vm385_vm10, %v825_v55, %v1563_v29 }
 0x1a2   : > { %v934_v36 = vpop.permute.xlu1 %933 }
 0x1a3   : > { %v935_v45 = vrot.slane %v934_v36, 4 }
 0x1a5   : > { %v936_v10 = vsel %vm503_vm11, %v935_v45, %v934_v36 }
 0x1a6   : > { %v970_v47 = vpop.permute.xlu1 %969 }
 0x1a7   : > { %v971_v52 = vrot.slane %v970_v47, 4 }
 0x1a9   : > { %v972_v59 = vsel %vm542_vm9, %v971_v52, %v970_v47  ;;  %vm1672_vm9 = vcmask 785408  }
 0x1aa   : > { %vm1673_vm10 = vmmov %vm1672_vm9 }
 0x211   : > { %v698_v63 = vpop.f32.mrb[0].mxu0 }
 0x212   : > { %v699_v0 = vadd.f32 %v698_v63, %v619_v62  ;;  %v700_v2 = vpop.f32.mrb[1].mxu0 }
 0x213   : > { %v701_v4 = vadd.f32 %v700_v2, %v619_v62 }
 0x214   : > { %v703_v5 = vmax.f32 %v699_v0, 0.0 }
 0x215   : > { %v704_v8 = vmax.f32 %v701_v4, 0.0 }
 0x217   : > { %v709_v13 = vcombine.low %v703_v5, %v704_v8 }
 0x219   : > { %710 = vrot.lane.b32.xlu0 %v709_v13, %s1281_s11 }
 0x21d   : > { %750 = vrot.lane.b32.xlu0 %v749_v1, %s1282_s16 }
 0x221   : > { %860 = vrot.lane.b32.xlu0 %v859_v17, %s1281_s11 }
 0x225   : > { %896 = vrot.lane.b32.xlu0 %v895_v21, %s1286_s26 }
 0x229   : > { %1006 = vrot.lane.b32.xlu0 %v1005_v24, %s1288_s28 }
 0x28b   : > { %v711_v26 = vpop.permute.xlu0 %710 }
 0x28c   : > { %v712_v28 = vrot.slane %v711_v26, 4 }
 0x28e   : > { %v713_v30 = vsel %vm260_vm3, %v712_v28, %v711_v26  ;;  %717 = vst.msk [vmem:[#allocation2 + $0x8] sm:$0xf] %vm268_vm4, %v712_v28 }
 0x28f   : > { %716 = vst.msk [vmem:[#allocation2] sm:$0xff] %vm1410_vm5, %v713_v30  ;;  %v751_v33 = vpop.permute.xlu0 %750  ;;  %vm1668_vm5 = vcmask 916480  }
 0x290   : > { %v752_v49 = vrot.slane %v751_v33, 4  ;;  %vm1669_vm6 = vmmov %vm1668_vm5 }
 0x292   : > { %v753_v56 = vsel %vm306_vm8, %v752_v49, %v751_v33 }
 0x293   : > { %v861_v35 = vpop.permute.xlu0 %860 }
 0x294   : > { %v862_v37 = vrot.slane %v861_v35, 4 }
 0x295   : > { %v848_v41 = vld [vmem:[#allocation2 + $0x8] sm:$0xf] }
 0x296   : > { %v1571_v40 = vld [vmem:[#allocation2] sm:$0xff]  ;;  %v775_v44 = vld [vmem:[#allocation2 + $0x8] sm:$0xf]  ;;  %v867_v6 = vmul.f32 %v862_v37, %v848_v41  ;;  %v863_v3 = vsel %vm260_vm3, %v862_v37, %v861_v35  ;;  %vm1666_vm3 = vcmask 1031168  }
 0x297   : > { %v731_v42 = vmul.f32 %v729_v34, %v1571_v40  ;;  %v897_v43 = vpop.permute.xlu0 %896  ;;  %v794_v46 = vmul.f32 %v789_v38, %v775_v44  ;;  %v921_v7 = vld [vmem:[#allocation2 + $0x8] sm:$0xf]  ;;  %v793_v51 = vmul.f32 %v790_v48, %v1571_v40  ;;  %v756_v57 = vmul.f32 %v753_v56, %v1571_v40  ;;  %vm1667_vm4 = vmmov %vm1666_vm3 }
 0x298   : > { %v898_v39 = vrot.slane %v897_v43, 4  ;;  %875 = vrot.lane.b32.xlu1 %v867_v6, %s1290_s9  ;;  %v940_v50 = vmul.f32 %v935_v45, %v921_v7  ;;  %v884_v61 = vld [vmem:[#allocation2 + $0x8] sm:$0xf]  ;;  %v975_v62 = vmul.f32 %v972_v59, %v1571_v40  ;;  %v829_v0 = vmul.f32 %v826_v60, %v1571_v40 }
 0x299   : > { %735 = vst [vmem:[#allocation3] sm:$0xf] %v731_v42  ;;  %802 = vrot.lane.b32.xlu0 %v794_v46, %s1289_s8  ;;  %v733_v54 = vcombine.high %v731_v42, %v731_v42  ;;  %v957_v2 = vld [vmem:[#allocation2 + $0x8] sm:$0xf]  ;;  %v866_v5 = vmul.f32 %v863_v3, %v1571_v40  ;;  %v939_v12 = vmul.f32 %v936_v10, %v1571_v40 }
 0x29a   : > { %v899_v53 = vsel %vm463_vm7, %v898_v39, %v897_v43  ;;  %v903_v63 = vmul.f32 %v898_v39, %v884_v61  ;;  %v976_v4 = vmul.f32 %v971_v52, %v957_v2  ;;  %v738_v11 = vld [vmem:[#allocation2 + $0x8] sm:$0xf]  ;;  %v797_v15 = vcombine.high %v793_v51, %v793_v51 }
 0x29b   : > { %736 = vst [vmem:[#allocation3 + $0x8] sm:$0xf] %v733_v54  ;;  %v902_v58 = vmul.f32 %v899_v53, %v1571_v40  ;;  %v757_v13 = vmul.f32 %v752_v49, %v738_v11  ;;  %v811_v14 = vld [vmem:[#allocation2 + $0x8] sm:$0xf]  ;;  %v1007_v18 = vpop.permute.xlu0 %1006  ;;  %v760_v19 = vcombine.low %v756_v57, %v756_v57  ;;  %v833_v22 = vcombine.low %v829_v0, %v829_v0 }
 0x29c   : > { %948 = vrot.lane.b32.xlu1 %v940_v50, %s1291_s10  ;;  %v907_v8 = vcombine.low %v903_v63, %v903_v63  ;;  %v980_v1 = vcombine.low %v976_v4, %v976_v4  ;;  %v830_v17 = vmul.f32 %v825_v55, %v811_v14  ;;  %v1008_v21 = vrot.slane %v1007_v18, 4  ;;  %v994_v30 = vld [vmem:[#allocation2 + $0x8] sm:$0xf] }
 0x29d   : > { %798 = vrot.lane.b32.xlu0 %v793_v51, %s1289_s8  ;;  %v761_v16 = vcombine.low %v757_v13, %v757_v13  ;;  %v870_v23 = vcombine.high %v866_v5, %v866_v5  ;;  %v943_v26 = vcombine.high %v939_v12, %v939_v12  ;;  %v906_v27 = vcombine.low %v902_v58, %v902_v58 }
 0x29e   : > { %v834_v20 = vcombine.low %v830_v17, %v830_v17  ;;  %v1009_v24 = vsel %vm582_vm12, %v1008_v21, %v1007_v18  ;;  %v979_v28 = vcombine.low %v975_v62, %v975_v62  ;;  %v1013_v31 = vmul.f32 %v1008_v21, %v994_v30 }
 0x29f   : > { %v1012_v25 = vmul.f32 %v1009_v24, %v1571_v40  ;;  %vm1670_vm7 = vcmask 908288  }
 0x2a0   : > { %764 = vrot.lane.b32.xlu1 %v756_v57, %s1293_s13  ;;  %vm1671_vm8 = vmmov %vm1670_vm7 }
 0x2a1   : > { %910 = vrot.lane.b32.xlu0 %v902_v58, %s1292_s12  ;;  %v1016_v29 = vcombine.high %v1012_v25, %v1012_v25 }
 0x2a4   : > { %837 = vrot.lane.b32.xlu1 %v829_v0, %s1295_s15 }
 0x2a5   : > { %983 = vrot.lane.b32.xlu0 %v975_v62, %s1294_s14 }
 0x2a8   : > { %912 = vrot.lane.b32.xlu1 %v907_v8, %s1292_s12 }
 0x2a9   : > { %871 = vrot.lane.b32.xlu0 %v866_v5, %s1290_s9 }
 0x2ac   : > { %985 = vrot.lane.b32.xlu1 %v980_v1, %s1294_s14 }
 0x2ad   : > { %944 = vrot.lane.b32.xlu0 %v939_v12, %s1291_s10 }
 0x2b0   : > { %800 = vrot.lane.b32.xlu1 %v797_v15, %s1289_s8 }
 0x2b1   : > { %766 = vrot.lane.b32.xlu0 %v761_v16, %s1293_s13 }
 0x2b4   : > { %762 = vrot.lane.b32.xlu1 %v760_v19, %s1293_s13 }
 0x2b5   : > { %839 = vrot.lane.b32.xlu0 %v834_v20, %s1295_s15 }
 0x2b8   : > { %835 = vrot.lane.b32.xlu1 %v833_v22, %s1295_s15 }
 0x2b9   : > { %873 = vrot.lane.b32.xlu0 %v870_v23, %s1290_s9  ;;  %v1029_v23 = vld [vmem:[%s1656_s4] sm:$0xf]  ;;  %s1674_s9 = sshll.u32 %s1676_s22, 3 }
 0x2ba   : > { %s251_s13 = scalar_lea.vmem %s1658_s6, %s1674_s9 }
 0x2bc   : > { %908 = vrot.lane.b32.xlu1 %v906_v27, %s1292_s12 }
 0x2bd   : > { %946 = vrot.lane.b32.xlu0 %v943_v26, %s1291_s10 }
 0x2c0   : > { %981 = vrot.lane.b32.xlu1 %v979_v28, %s1294_s14 }
 0x2c1   : > { %1019 = vrot.lane.b32.xlu0 %v1016_v29, %s1296_s18 }
 0x2c4   : > { %1021 = vrot.lane.b32.xlu1 %v1013_v31, %s1296_s18 }
 0x2c5   : > { %1017 = vrot.lane.b32.xlu0 %v1012_v25, %s1296_s18  ;;  %v1126_v25 = vcombine.high %v1370_v9, %v1370_v9 }
 0x2c8   : > { %1043 = vperm.xlu1 %1269, %v1040_v32  }
 0x30a   : > { %v876_v33 = vpop.permute.xlu1 %875 }
 0x30b   : > { %v803_v34 = vpop.permute.xlu0 %802 }
 0x30e   : > { %v949_v35 = vpop.permute.xlu1 %948 }
 0x30f   : > { %v799_v36 = vpop.permute.xlu0 %798 }
 0x312   : > { %v765_v37 = vpop.permute.xlu1 %764 }
 0x313   : > { %v911_v38 = vpop.permute.xlu0 %910 }
 0x316   : > { %v838_v40 = vpop.permute.xlu1 %837 }
 0x317   : > { %v984_v41 = vpop.permute.xlu0 %983 }
 0x31a   : > { %v913_v42 = vpop.permute.xlu1 %912 }
 0x31b   : > { %v872_v43 = vpop.permute.xlu0 %871  ;;  %v915_v44 = vsel %vm479_vm13, %v911_v38, %v913_v42 }
 0x31c   : > { %919 = vst [vmem:[#allocation3 + $0x28] sm:$0xf0] %v915_v44 }
 0x31e   : > { %v986_v45 = vpop.permute.xlu1 %985 }
 0x31f   : > { %v945_v6 = vpop.permute.xlu0 %944  ;;  %v988_v46 = vsel %vm558_vm14, %v984_v41, %v986_v45 }
 0x320   : > { %992 = vst [vmem:[#allocation3 + $0x38] sm:$0xf0] %v988_v46 }
 0x322   : > { %v801_v7 = vpop.permute.xlu1 %800 }
 0x323   : > { %v767_v39 = vpop.permute.xlu0 %766  ;;  %v804_v47 = vsel %vm1666_vm3, %v799_v36, %v801_v7  ;;  %v805_v48 = vsel %vm1667_vm4, %v801_v7, %v803_v34 }
 0x324   : > { %v769_v49 = vsel %vm322_vm15, %v765_v37, %v767_v39  ;;  %808 = vst [vmem:[#allocation3 + $0x10] sm:$0xf] %v804_v47  ;;  %809 = vst [vmem:[#allocation3 + $0x18] sm:$0xf] %v805_v48 }
 0x325   : > { %773 = vst [vmem:[#allocation3 + $0x8] sm:$0xf0] %v769_v49 }
 0x326   : > { %v763_v50 = vpop.permute.xlu1 %762 }
 0x327   : > { %v840_v51 = vpop.permute.xlu0 %839  ;;  %v768_v52 = vsel %vm322_vm15, %v763_v50, %v765_v37 }
 0x328   : > { %v842_v53 = vsel %vm1668_vm5, %v838_v40, %v840_v51  ;;  %772 = vst [vmem:[#allocation3] sm:$0xf0] %v768_v52 }
 0x329   : > { %846 = vst [vmem:[#allocation3 + $0x18] sm:$0xf0] %v842_v53 }
 0x32a   : > { %v836_v54 = vpop.permute.xlu1 %835 }
 0x32b   : > { %v874_v55 = vpop.permute.xlu0 %873  ;;  %v841_v56 = vsel %vm1669_vm6, %v836_v54, %v838_v40 }
 0x32c   : > { %v877_v57 = vsel %vm1670_vm7, %v872_v43, %v874_v55  ;;  %v878_v58 = vsel %vm1671_vm8, %v874_v55, %v876_v33  ;;  %845 = vst [vmem:[#allocation3 + $0x10] sm:$0xf0] %v841_v56  ;;  %v1031_v0 = vld [vmem:[#allocation3 + $0x8] sm:$0xff] }
 0x32d   : > { %881 = vst [vmem:[#allocation3 + $0x20] sm:$0xf] %v877_v57  ;;  %882 = vst [vmem:[#allocation3 + $0x28] sm:$0xf] %v878_v58 }
 0x32e   : > { %v909_v59 = vpop.permute.xlu1 %908 }
 0x32f   : > { %v947_v60 = vpop.permute.xlu0 %946  ;;  %v914_v61 = vsel %vm479_vm13, %v909_v59, %v911_v38  ;;  %v1030_v10 = vld [vmem:[#allocation3] sm:$0xff] }
 0x330   : > { %v950_v62 = vsel %vm1672_vm9, %v945_v6, %v947_v60  ;;  %v951_v63 = vsel %vm1673_vm10, %v947_v60, %v949_v35  ;;  %v1033_v2 = vld [vmem:[#allocation3 + $0x18] sm:$0xff]  ;;  %918 = vst [vmem:[#allocation3 + $0x20] sm:$0xf0] %v914_v61 }
 0x331   : > { %954 = vst [vmem:[#allocation3 + $0x30] sm:$0xf] %v950_v62  ;;  %955 = vst [vmem:[#allocation3 + $0x38] sm:$0xf] %v951_v63  ;;  %v1235_v3 = vpack.c.bf16 %v1033_v2, %v1031_v0 }
 0x332   : > { %v982_v4 = vpop.permute.xlu1 %981 }
 0x333   : > { %1236 = vmatprep.subr.bf16.mxu1 %v1235_v3  ;;  %v1020_v5 = vpop.permute.xlu0 %1019  ;;  %v987_v8 = vsel %vm558_vm14, %v982_v4, %v984_v41  ;;  %v1032_v11 = vld [vmem:[#allocation3 + $0x10] sm:$0xff] }
 0x334   : > { %991 = vst [vmem:[#allocation3 + $0x30] sm:$0xf0] %v987_v8  ;;  %v1237_v12 = vpack.c.bf16 %v1032_v11, %v1030_v10  ;;  %v1035_v16 = vld [vmem:[#allocation3 + $0x28] sm:$0xff] }
 0x336   : > { %v1022_v13 = vpop.permute.xlu1 %1021  ;;  %1238 = vmatpush1.bf16.msra.mxu1 %v1237_v12 }
 0x337   : > { %v1018_v1 = vpop.permute.xlu0 %1017  ;;  %v1024_v14 = vsel %vm597_vm2, %v1020_v5, %v1022_v13  ;;  %v1034_v19 = vld [vmem:[#allocation3 + $0x20] sm:$0xff] }
 0x338   : > { %v1023_v15 = vsel %vm597_vm2, %v1018_v1, %v1020_v5  ;;  %v1037_v17 = vld [vmem:[#allocation3 + $0x38] sm:$0xff]  ;;  %1028 = vst [vmem:[#allocation3 + $0x48] sm:$0xf] %v1024_v14 }
 0x339   : > { %1027 = vst [vmem:[#allocation3 + $0x40] sm:$0xf] %v1023_v15  ;;  %v1239_v18 = vpack.c.bf16 %v1037_v17, %v1035_v16 }
 0x33b   : > { %1240 = vmatprep.subr.bf16.mxu1 %v1239_v18  ;;  %v1036_v20 = vld [vmem:[#allocation3 + $0x30] sm:$0xff] }
 0x33c   : > { %v1241_v21 = vpack.c.bf16 %v1036_v20, %v1034_v19 }
 0x33e   : > { %1242 = vmatpush1.bf16.msra.mxu1 %v1241_v21 }
 0x33f   : > { %v1039_v22 = vld [vmem:[#allocation3 + $0x48] sm:$0xf] }
 0x340   : > { %1220 = vmatprep.subr.msk.mxu1 %vm625_vm0, %v1039_v22  ;;  %v1038_v24 = vld [vmem:[#allocation3 + $0x40] sm:$0xf] }
 0x342   : > { %1221 = vmatpush1.msk.msra.mxu1 %vm625_vm0, %v1038_v24 }
 0x343   : > { %1222 = vmatmul.mubr.msk.f32.vlgmr.msra.gmra.mrb[0].mxu1 %vm621_vm1, %v1029_v23 }
 0x347   : > { %v1044_v26 = vpop.permute.xlu1 %1043 }
 0x416   : > { %v1121_v27 = vpop.f32.mrb[0].mxu1 }
 0x417   : > { %v1122_v28 = vadd.f32 %v1121_v27, %v1044_v26  ;;  %v1123_v29 = vpop.f32.mrb[1].mxu1 }
 0x418   : > { %v1124_v30 = vadd.f32 %v1123_v29, %v1044_v26 }
 0x419   : > { %v1128_v31 = vadd.f32 %v1122_v28, %v1370_v9 }
 0x41a   : > { %v1129_v32 = vadd.f32 %v1126_v25, %v1124_v30 }
 0x41b   : > { %v1130_v33 = vmax.f32 %v1128_v31, 0.0 }
 0x41c   : > { %v1131_v34 = vmax.f32 %v1129_v32, 0.0 }
 0x41e   : > { %v1134_v35 = vcombine.low %v1130_v33, %v1131_v34 }
 0x420   : > { %1136 = vst [vmem:[%s251_s13] sm:$0xff] %v1134_v35 }
 0x421 PF: > { %s16_s21 = sadd.s32 1, %s1278_s21  }
 0x422   : > { %p13_p4 = scmp.ge.s32.totalorder %s16_s21, 4  }
 0x424   :  { %15 = sbr.rel (!%p13_p4) target bundleno = 1 (0x1), region = 82 }

</bundles_post_ra>
